<compile_context>
chip_gen: v6e
topology: v6e:2x2x1
jax: 0.10.0
libtpu: 0.0.40
codegen_flags: <defaults>
</compile_context>

<pallas_src>
import jax
import jax.numpy as jnp
from jax.experimental import pallas as pl
from jax.experimental.pallas import tpu as pltpu


def _local_module_kernel(p_ref, w3_ref, b3_ref, w1_ref, b1_ref, o_ref):
    """Fused (3x3 conv + folded BN) + ReLU + 1x1 conv for one lane tile.

    p_ref  : (K, LT)  bf16  im2col patches, K = 9*Cin_pad, LT = lane tile of N*H*W
    w3_ref : (mid, K) bf16  folded 3x3 conv weight (taps*channels on K axis)
    b3_ref : (mid, 1) f32   folded 3x3 conv / BN bias
    w1_ref : (1, mid) bf16  1x1 conv weight
    b1_ref : (1,)     f32   1x1 conv bias (SMEM scalar)
    o_ref  : (1, LT)  f32   lane-dense output row
    """
    # Single MXU matmul over the folded contraction axis (K = 9*Cin_pad).
    acc = jnp.dot(w3_ref[...], p_ref[...],
                  preferred_element_type=jnp.float32)          # (mid, LT) f32
    acc = jnp.maximum(acc + b3_ref[...], 0.0)                  # bias + ReLU in f32
    # 1x1 conv: (1, mid) @ (mid, LT) -> lane-dense (1, LT).
    out = jnp.dot(w1_ref[...], acc.astype(jnp.bfloat16),
                  preferred_element_type=jnp.float32)
    o_ref[...] = out + b1_ref[0]


def _pick_lane_tile(s_total, cap=2048):
    """Largest lane tile <= cap that is a multiple of 128 and divides s_total."""
    lt = min(s_total, cap)
    lt -= lt % 128
    while lt >= 128:
        if s_total % lt == 0:
            return lt
        lt -= 128
    return s_total  # full extent is always a legal block shape


def local_module_forward(x, init_map, distance_map, params):
    """x: (N, C, H, W), init_map/distance_map: (N, 1, H, W) (NCHW, like PyTorch).

    Returns (N, 1, H, W) float32, matching LocalModule.forward.
    """
    del distance_map  # unused by the PyTorch forward
    w3f, b3f, w1, b1 = params
    N, C, H, W = x.shape
    Cin = C + 1
    Cin_pad = 8                      # pad channels 5 -> 8 (dense sublane packing)
    mid = w3f.shape[-1]
    K = 9 * Cin_pad
    S = H * W
    S_total = N * S
    LT = _pick_lane_tile(S_total)

    # --- glue: channel-major concat, channel pad, bf16 cast, spatial zero pad.
    outf = jnp.concatenate([init_map, x], axis=1).astype(jnp.float32)   # (N,Cin,H,W)
    outf = jnp.pad(outf, ((0, 0), (0, Cin_pad - Cin), (0, 0), (0, 0)))
    xp = jnp.pad(outf.astype(jnp.bfloat16),
                 ((0, 0), (0, 0), (1, 1), (1, 1)))                      # (N,8,H+2,W+2)

    # im2col stack: tap-major / channel-inner ordering, batch folded into lanes.
    taps = [xp[:, :, dy:dy + H, dx:dx + W]
            for dy in range(3) for dx in range(3)]
    p = jnp.stack(taps, axis=1).reshape(N, K, S)                        # (N, K, S)
    p = jnp.moveaxis(p, 0, 1).reshape(K, S_total)                       # (K, N*S)
    # TODO(synk): at production DB-head resolutions build this im2col inside the
    # kernel (channel-major padded block + lane shifts / pltpu.roll) to avoid the
    # 9x input HBM blow-up; at 16x16 the wrapper materialization is negligible and
    # keeps the kernel a single dense MXU matmul.

    # weights in kernel layout.
    w3p = jnp.pad(w3f, ((0, 0), (0, 0), (0, Cin_pad - Cin), (0, 0)))    # (3,3,8,mid)
    w3t = jnp.transpose(w3p.reshape(K, mid)).astype(jnp.bfloat16)       # (mid, K)
    b3v = b3f.reshape(mid, 1).astype(jnp.float32)                       # (mid, 1)
    w1t = jnp.transpose(w1).astype(jnp.bfloat16)                        # (1, mid)
    b1v = b1.reshape(1).astype(jnp.float32)                             # (1,)

    grid = (S_total // LT,)
    out_flat = pl.pallas_call(
        _local_module_kernel,
        out_shape=jax.ShapeDtypeStruct((1, S_total), jnp.float32),
        grid_spec=pltpu.PrefetchScalarGridSpec(
            num_scalar_prefetch=0,
            grid=grid,
            in_specs=[
                pl.BlockSpec((K, LT), lambda t: (0, t)),
                pl.BlockSpec((mid, K), lambda t: (0, 0)),
                pl.BlockSpec((mid, 1), lambda t: (0, 0)),
                pl.BlockSpec((1, mid), lambda t: (0, 0)),
                pl.BlockSpec(memory_space=pltpu.MemorySpace.SMEM),
            ],
            out_specs=pl.BlockSpec((1, LT), lambda t: (0, t)),
        ),
        compiler_params=pltpu.CompilerParams(
            dimension_semantics=("parallel",)),
    )(p, w3t, b3v, w1t, b1v)

    return out_flat.reshape(N, H, W)[:, None, :, :]                     # (N,1,H,W)


def make_params(in_c, mid_c, key):
    """Deterministic synthetic parameters; BatchNorm (eval mode) folded into conv3."""
    k1, k2, k3, k4 = jax.random.split(key, 4)
    cin = in_c + 1
    w3 = jax.random.normal(k1, (3, 3, cin, mid_c), jnp.float32) * 0.1
    b3 = jax.random.normal(k2, (mid_c,), jnp.float32) * 0.1
    w1 = jax.random.normal(k3, (mid_c, 1), jnp.float32) * 0.1
    b1 = jax.random.normal(k4, (1,), jnp.float32) * 0.1

    # BatchNorm2d default init, eval-mode semantics, folded into the 3x3 conv.
    gamma = jnp.ones((mid_c,), jnp.float32)
    beta = jnp.zeros((mid_c,), jnp.float32)
    mean = jnp.zeros((mid_c,), jnp.float32)
    var = jnp.ones((mid_c,), jnp.float32)
    eps = 1e-5
    scale = gamma / jnp.sqrt(var + eps)
    w3_f = w3 * scale                       # broadcast over Cout (last dim)
    b3_f = (b3 - mean) * scale + beta
    return w3_f, b3_f, w1, b1


def _reference(x, init_map, params):
    """Pure-JAX reference mirroring the kernel's bf16-operand / f32-accum precision."""
    w3f, b3f, w1, b1 = params
    outf = jnp.concatenate([init_map, x], axis=1).astype(jnp.float32)   # NCHW
    outf = jnp.transpose(outf, (0, 2, 3, 1)).astype(jnp.bfloat16)       # NHWC bf16
    y = jax.lax.conv_general_dilated(
        outf, w3f.astype(jnp.bfloat16), window_strides=(1, 1), padding="SAME",
        dimension_numbers=("NHWC", "HWIO", "NHWC"),
        preferred_element_type=jnp.float32) + b3f
    y = jnp.maximum(y, 0.0).astype(jnp.bfloat16)
    z = jnp.einsum("nhwc,co->nhwo", y, w1.astype(jnp.bfloat16),
                   preferred_element_type=jnp.float32) + b1
    return jnp.transpose(z, (0, 3, 1, 2))


if __name__ == "__main__":
    N, C, H, W = 2, 4, 16, 16
    mid_c = 32

    key = jax.random.PRNGKey(0)
    kx, ki, kd, kp = jax.random.split(key, 4)
    x = jax.random.normal(kx, (N, C, H, W), jnp.float32)
    init_map = jax.random.normal(ki, (N, 1, H, W), jnp.float32)
    distance_map = jax.random.normal(kd, (N, 1, H, W), jnp.float32)  # unused

    params = make_params(C, mid_c, kp)

    out = local_module_forward(x, init_map, distance_map, params)
    out = jax.block_until_ready(out)

    ref = _reference(x, init_map, params)
    assert out.shape == (N, 1, H, W)
    assert jnp.allclose(out, ref, atol=2e-3, rtol=2e-3), "mismatch vs reference"

    print("KERNEL_OK")
</pallas_src>

<mosaic_0001>
module attributes {stable_mosaic.version = 11 : i64} {
  func.func @_local_module_kernel(%arg0: i32, %arg1: memref<72x512xbf16, #tpu.memory_space<vmem>>, %arg2: memref<32x72xbf16, #tpu.memory_space<vmem>>, %arg3: memref<32x1xf32, #tpu.memory_space<vmem>>, %arg4: memref<1x32xbf16, #tpu.memory_space<vmem>>, %arg5: memref<1xf32, #tpu.memory_space<smem>>, %arg6: memref<1x512xf32, #tpu.memory_space<vmem>>) attributes {dimension_semantics = [#tpu.dimension_semantics<parallel>], iteration_bounds = array<i64: 1>, scalar_prefetch = 0 : i64, scratch_operands = 0 : i64, tpu.core_type = #tpu.core_type<tc>, window_params = [{transform_indices = @transform_0, window_bounds = array<i64: 72, 512>}, {pipeline_mode = #tpu.pipeline_mode<synchronous>, transform_indices = @transform_1, window_bounds = array<i64: 32, 72>}, {pipeline_mode = #tpu.pipeline_mode<synchronous>, transform_indices = @transform_2, window_bounds = array<i64: 32, 1>}, {pipeline_mode = #tpu.pipeline_mode<synchronous>, transform_indices = @transform_3, window_bounds = array<i64: 1, 32>}, {transform_indices = @transform_4, window_bounds = array<i64: 1>}, {transform_indices = @transform_5, window_bounds = array<i64: 1, 512>}]} {
    %c0 = arith.constant 0 : index
    %c0_0 = arith.constant 0 : index
    %0 = vector.load %arg2[%c0, %c0_0] : memref<32x72xbf16, #tpu.memory_space<vmem>>, vector<32x72xbf16>
    %c0_1 = arith.constant 0 : index
    %c0_2 = arith.constant 0 : index
    %1 = vector.load %arg1[%c0_1, %c0_2] : memref<72x512xbf16, #tpu.memory_space<vmem>>, vector<72x512xbf16>
    %cst = arith.constant dense<0.000000e+00> : vector<32x512xf32>
    %2 = tpu.matmul %0, %1, %cst {dimension_numbers = #tpu.dot_dimension_numbers<[1], [0], [0], [1], [0, 0, 1, 1], [], []>} : vector<32x72xbf16>, vector<72x512xbf16>, vector<32x512xf32> -> vector<32x512xf32>
    %c0_3 = arith.constant 0 : index
    %c0_4 = arith.constant 0 : index
    %3 = vector.load %arg3[%c0_3, %c0_4] : memref<32x1xf32, #tpu.memory_space<vmem>>, vector<32x1xf32>
    %4 = vector.broadcast %3 : vector<32x1xf32> to vector<32x512xf32>
    %5 = arith.addf %2, %4 : vector<32x512xf32>
    %cst_5 = arith.constant 0.000000e+00 : f32
    %6 = vector.broadcast %cst_5 : f32 to vector<32x512xf32>
    %7 = arith.maximumf %5, %6 : vector<32x512xf32>
    %c0_6 = arith.constant 0 : index
    %c0_7 = arith.constant 0 : index
    %8 = vector.load %arg4[%c0_6, %c0_7] : memref<1x32xbf16, #tpu.memory_space<vmem>>, vector<1x32xbf16>
    %9 = arith.truncf %7 : vector<32x512xf32> to vector<32x512xbf16>
    %cst_8 = arith.constant dense<0.000000e+00> : vector<1x512xf32>
    %10 = tpu.matmul %8, %9, %cst_8 {dimension_numbers = #tpu.dot_dimension_numbers<[1], [0], [0], [1], [0, 0, 1, 1], [], []>} : vector<1x32xbf16>, vector<32x512xbf16>, vector<1x512xf32> -> vector<1x512xf32>
    %c0_9 = arith.constant 0 : index
    %11 = memref.load %arg5[%c0_9] : memref<1xf32, #tpu.memory_space<smem>>
    %12 = vector.broadcast %11 : f32 to vector<1x512xf32>
    %13 = arith.addf %10, %12 : vector<1x512xf32>
    %c0_10 = arith.constant 0 : index
    %c0_11 = arith.constant 0 : index
    %14 = vector.load %arg6[%c0_10, %c0_11] : memref<1x512xf32, #tpu.memory_space<vmem>>, vector<1x512xf32>
    tpu.vector_store %arg6[%c0_10, %c0_11], %13 {strides = array<i32>} : memref<1x512xf32, #tpu.memory_space<vmem>>, vector<1x512xf32>,
    return
  }
  func.func @transform_0(%arg0: i32) -> (i32, i32) {
    %c0_i32 = arith.constant 0 : i32
    %c0_i32_0 = arith.constant 0 : i32
    return %c0_i32, %arg0 : i32, i32
  }
  func.func @transform_1(%arg0: i32) -> (i32, i32) {
    %c0_i32 = arith.constant 0 : i32
    %c0_i32_0 = arith.constant 0 : i32
    %c0_i32_1 = arith.constant 0 : i32
    return %c0_i32, %c0_i32_0 : i32, i32
  }
  func.func @transform_2(%arg0: i32) -> (i32, i32) {
    %c0_i32 = arith.constant 0 : i32
    %c0_i32_0 = arith.constant 0 : i32
    %c0_i32_1 = arith.constant 0 : i32
    return %c0_i32, %c0_i32_0 : i32, i32
  }
  func.func @transform_3(%arg0: i32) -> (i32, i32) {
    %c0_i32 = arith.constant 0 : i32
    %c0_i32_0 = arith.constant 0 : i32
    %c0_i32_1 = arith.constant 0 : i32
    return %c0_i32, %c0_i32_0 : i32, i32
  }
  func.func @transform_4(%arg0: i32) -> i32 {
    %c0_i32 = arith.constant 0 : i32
    %c0_i32_0 = arith.constant 0 : i32
    return %c0_i32 : i32
  }
  func.func @transform_5(%arg0: i32) -> (i32, i32) {
    %c0_i32 = arith.constant 0 : i32
    %c0_i32_0 = arith.constant 0 : i32
    return %c0_i32, %arg0 : i32, i32
  }
}

</mosaic_0001>

<bundles_post_ra>
// kernel: tpu_custom_call.1
= control target key start
LH: loop header
LB: loop body
LE: loop exit
PB: predicated region body
PF: predicated region fallthrough
CT: control target
= control target key end

     0   :  { %11 = vsyncpa [#allocation4], 0  ;;  %s657_s0 = inlined_call_operand.hbm [shape: bf16[72,512], index: 0, kind: input, shape index: {}]   ;;  %s658_s1 = inlined_call_operand.vmem [shape: bf16[32,72], index: 1, kind: input, shape index: {}]   ;;  %s659_s2 = inlined_call_operand.vmem [shape: f32[32,1], index: 2, kind: input, shape index: {}]   ;;  %s660_s3 = inlined_call_operand.vmem [shape: bf16[1,32], index: 3, kind: input, shape index: {}]   ;;  %s661_s4 = inlined_call_operand.<no memory space> [shape: f32[1], index: 4, kind: input, shape index: {}]   ;;  %s662_s5 = inlined_call_operand.hbm [shape: f32[1,512], index: 5, kind: output, shape index: {}]  }
   0x1   :  { %12 = vsyncpa [#allocation5], 0  ;;  %s583_s18 = smov [#allocation3]  }
   0x2   :  { %s18_s19 = sshll.u32 %s583_s18, 4  ;;  %s19_s19 = int_to_ptr.vmem [resolvable:$true] %s18_s19 }
   0x3   :  { %s547_s20 = scalar_lea.vmem %s19_s19, 2304  ;;  %p552_p1 = scmp.lt.s32.totalorder %s19_s19, %s19_s19 }
   0x4   :  { %p548_p0 = scmp.ne.s32.totalorder %s19_s19, %s547_s20  ;;  %p553_p2 = scmp.lt.s32.totalorder %s547_s20, %s547_s20 }
   0x6   :  { %p554_p3 = por %p553_p2, %p552_p1 }
   0x8   :  { %p555_p4 = pnand %p554_p3, %p548_p0 }
   0xa   :  { %558 = shalt.err (!%p555_p4)
}
   0xb   :  { %s584_s21 = smov 256   ;;  %s585_s22 = smov 16  }
   0xc   :  { %24 = dma.hbm_to_vmem [thread:$0]  %s657_s0, 2304, %s19_s19, [#allocation4], %s584_s21, %s584_s21, %s585_s22  }
   0xd   :  { %579 = dma.done.wait [#allocation4], 2304  }
   0xe   :  { %580 = vsyncadd [#allocation4], 4294964992  ;;  %v586_v0 = vmov 0   ;;  %v57_v1 = vld [vmem:[#allocation3 + $0x80] sm:$0xff]  ;;  %vm190_vm0 = vcmask 1043456   ;;  %v58_v2 = vld [vmem:[#allocation3 + $0x88] sm:$0xff] }
   0xf   :  { %235 = vmatprep.mubr.bf16.mxu0 %v586_v0  ;;  %288 = vmatprep.mubr.bf16.mxu1 %v586_v0  ;;  %v490_v3 = vcombine.high %v57_v1, %v57_v1  ;;  %v492_v4 = vcombine.high %v58_v2, %v58_v2  ;;  %v489_v5 = vcombine.low %v57_v1, %v57_v1  ;;  %v513_v7 = vld [vmem:[#allocation3 + $0x64] ss:$16 sps:$4 sm:$0xff]   ;;  %v515_v8 = vld [vmem:[#allocation3 + $0x6c] ss:$16 sps:$4 sm:$0xff]   ;;  %v517_v11 = vld [vmem:[#allocation3 + $0x60] ss:$16 sps:$4 sm:$0xff]  }
  0x10   :  { %508 = vset.pattern.permute.xlu1 %v586_v0  ;;  %507 = vset.pattern.permute.xlu0 %v586_v0  ;;  %v491_v6 = vcombine.low %v58_v2, %v58_v2  ;;  %v518_v12 = vld [vmem:[#allocation3 + $0x68] ss:$16 sps:$4 sm:$0xff]   ;;  %v519_v13 = vld [vmem:[#allocation3 + $0x44] ss:$16 sps:$4 sm:$0xff]   ;;  %v521_v14 = vld [vmem:[#allocation3 + $0x4c] ss:$16 sps:$4 sm:$0xff]  }
  0x11   :  { %493 = vmatprep.subr.msk.bf16.mxu0 %vm190_vm0, %v490_v3  ;;  %496 = vmatprep.subr.msk.bf16.mxu1 %vm190_vm0, %v492_v4  ;;  %v192_v9 = vsel %vm190_vm0, %v489_v5, 0  ;;  %v523_v15 = vld [vmem:[#allocation3 + $0x40] ss:$16 sps:$4 sm:$0xff]   ;;  %v524_v16 = vld [vmem:[#allocation3 + $0x48] ss:$16 sps:$4 sm:$0xff]   ;;  %vm183_vm1 = vcmask 588800  }
  0x12   :  { %v198_v10 = vsel %vm190_vm0, %v491_v6, 0  ;;  %210 = vmatpush1.bf16.msra.mxu0 %v192_v9  ;;  %v525_v17 = vld [vmem:[#allocation3 + $0x24] ss:$16 sps:$4 sm:$0xff]   ;;  %v527_v18 = vld [vmem:[#allocation3 + $0x2c] ss:$16 sps:$4 sm:$0xff]   ;;  %vm336_vm2 = vcmask 261120  }
  0x13   :  { %263 = vmatpush1.bf16.msra.mxu1 %v198_v10  ;;  %211 = vmatprep.subr.bf16.mxu0 %v513_v7  ;;  %v529_v19 = vld [vmem:[#allocation3 + $0x20] ss:$16 sps:$4 sm:$0xff]   ;;  %v530_v20 = vld [vmem:[#allocation3 + $0x28] ss:$16 sps:$4 sm:$0xff]   ;;  %v531_v21 = vld [vmem:[#allocation3 + $0x4] ss:$16 sps:$4 sm:$0xff]  }
  0x14   :  { %264 = vmatprep.subr.bf16.mxu1 %v515_v8  ;;  %v533_v22 = vld [vmem:[#allocation3 + $0xc] ss:$16 sps:$4 sm:$0xff]   ;;  %v59_v23 = vld [vmem:[%s659_s2] sm:$0xff]  ;;  %v61_v24 = vld [vmem:[%s659_s2 + $0x10] sm:$0xff] }
  0x15   :  { %65 = vperm.xlu1 %508, %v59_v23   ;;  %v60_v25 = vld [vmem:[%s659_s2 + $0x8] sm:$0xff]  ;;  %75 = vperm.xlu0 %507, %v61_v24   ;;  %v535_v26 = vld [vmem:[#allocation3] ss:$16 sps:$4 sm:$0xff]   ;;  %v62_v28 = vld [vmem:[%s659_s2 + $0x18] sm:$0xff] }
  0x16   :  { %212 = vmatpush1.bf16.msra.mxu0 %v517_v11  ;;  %v536_v27 = vld [vmem:[#allocation3 + $0x8] ss:$16 sps:$4 sm:$0xff]   ;;  %v537_v29 = vld [vmem:[%s658_s1] sm:$0xff]  }
  0x17   :  { %265 = vmatpush1.bf16.msra.mxu1 %v518_v12  ;;  %213 = vmatprep.subr.bf16.mxu0 %v519_v13  ;;  %v538_v30 = vld [vmem:[%s658_s1 + $0x8] sm:$0xff]  }
  0x18   :  { %266 = vmatprep.subr.bf16.mxu1 %v521_v14 }
  0x19   :  { %70 = vperm.xlu1 %508, %v60_v25   ;;  %80 = vperm.xlu0 %507, %v62_v28   ;;  %v587_v28 = vmov 1966171168  }
  0x1a   :  { %214 = vmatpush1.bf16.msra.mxu0 %v523_v15 }
  0x1b   :  { %267 = vmatpush1.bf16.msra.mxu1 %v524_v16  ;;  %215 = vmatprep.subr.bf16.mxu0 %v525_v17 }
  0x1c   :  { %268 = vmatprep.subr.bf16.mxu1 %v527_v18 }
  0x1e   :  { %216 = vmatpush1.bf16.msra.mxu0 %v529_v19 }
  0x1f   :  { %269 = vmatpush1.bf16.msra.mxu1 %v530_v20  ;;  %217 = vmatprep.subr.bf16.mxu0 %v531_v21 }
  0x20   :  { %270 = vmatprep.subr.bf16.mxu1 %v533_v22 }
  0x22   :  { %218 = vmatpush1.bf16.msra.mxu0 %v535_v26 }
  0x23   :  { %271 = vmatpush1.bf16.msra.mxu1 %v536_v27  ;;  %v325_v27 = vld [vmem:[%s660_s3] sm:$0x1]  ;;  %s588_s3 = smov [#allocation6]  }
  0x24   :  { %s462_s13 = sshll.u32 %s588_s3, 4  ;;  %s463_s13 = int_to_ptr.vmem [resolvable:$true] %s462_s13 }
  0x25   :  { %494 = vmatmul.mubr.msk.bf16.vlgmr.msra.gmra.mxu0 %vm183_vm1, %v537_v29  ;;  %p564_p6 = scmp.lt.s32.totalorder %s463_s13, %s463_s13 }
  0x26   :  { %497 = vmatmul.mubr.msk.bf16.vlgmr.msra.gmra.mxu1 %vm183_vm1, %v537_v29  ;;  %245 = vmatprep.mubr.bf16.mxu0 %v586_v0  ;;  %v429_v29 = vunpack.c.l.s4 %v587_v28 }
  0x27   :  { %298 = vmatprep.mubr.bf16.mxu1 %v586_v0 }
  0x2d   :  { %495 = vmatmul.mubr.msk.bf16.gmra.mxu0 %vm183_vm1, %v538_v30 }
  0x2e   :  { %498 = vmatmul.mubr.msk.bf16.gmra.mxu1 %vm183_vm1, %v538_v30  ;;  %372 = vmatprep.mubr.bf16.mxu0 %v586_v0  ;;  %v431_v30 = vlaneseq }
  0x2f   :  { %413 = vmatprep.mubr.bf16.mxu1 %v586_v0 }
  0x30   :  { %vm453_vm3 = vcmp.lt.s32.totalorder %v431_v30, 512 }
  0x90   :  { %v66_v37 = vpop.permute.xlu1 %65  ;;  %v76_v38 = vpop.permute.xlu0 %75 }
  0x94   :  { %v71_v45 = vpop.permute.xlu1 %70  ;;  %v81_v46 = vpop.permute.xlu0 %80 }
  0xe5   :  { %v237_v31 = vpop.f32.mrf.mxu0 }
  0xe6   :  { %v290_v32 = vpop.f32.mrf.mxu1  ;;  %v238_v9 = vadd.f32 %v237_v31, %v66_v37  ;;  %v430_v31 = vunpack.c.0.s8 %v429_v29 }
  0xe7   :  { %v239_v33 = vpop.f32.mrf.mxu0  ;;  %v291_v10 = vadd.f32 %v290_v32, %v66_v37  ;;  %v432_v32 = vshrl.u32 %v431_v30, 7 }
  0xe8   :  { %v292_v34 = vpop.f32.mrf.mxu1  ;;  %v240_v55 = vadd.f32 %v239_v33, %v66_v37  ;;  %v309_v23 = vmax.f32 %v238_v9, 0.0  ;;  %v335_v33 = vstv %s661_s4  ;;  %s559_s4 = scalar_lea.vmem %s463_s13, 64 }
  0xe9   :  { %v241_v35 = vpop.f32.mrf.mxu0  ;;  %v293_v56 = vadd.f32 %v292_v34, %v66_v37  ;;  %v311_v24 = vmax.f32 %v291_v10, 0.0  ;;  %v433_v37 = vsub.s32 %v430_v31, %v432_v32  ;;  %p560_p5 = scmp.ne.s32.totalorder %s463_s13, %s559_s4  ;;  %p565_p7 = scmp.lt.s32.totalorder %s559_s4, %s559_s4 }
  0xea   :  { %v294_v36 = vpop.f32.mrf.mxu1  ;;  %v242_v61 = vadd.f32 %v241_v35, %v71_v45  ;;  %v310_v13 = vmax.f32 %v240_v55, 0.0 }
  0xeb   :  { %v243_v39 = vpop.f32.mrf.mxu0  ;;  %v295_v62 = vadd.f32 %v294_v36, %v71_v45  ;;  %v312_v14 = vmax.f32 %v293_v56, 0.0  ;;  %p566_p8 = por %p565_p7, %p564_p6 }
  0xec   :  { %v296_v40 = vpop.f32.mrf.mxu1  ;;  %v244_v47 = vadd.f32 %v243_v39, %v71_v45  ;;  %v313_v17 = vmax.f32 %v242_v61, 0.0 }
  0xed   :  { %v247_v41 = vpop.f32.mrf.mxu0  ;;  %v297_v48 = vadd.f32 %v296_v40, %v71_v45  ;;  %v315_v18 = vmax.f32 %v295_v62, 0.0  ;;  %p567_p9 = pnand %p566_p8, %p560_p5 }
  0xee   :  { %v300_v42 = vpop.f32.mrf.mxu1  ;;  %v248_v57 = vadd.f32 %v247_v41, %v76_v38  ;;  %v314_v1 = vmax.f32 %v244_v47, 0.0  ;;  %v326_v25 = vpack.c.bf16 %v313_v17, %v309_v23 }
  0xef   :  { %v249_v43 = vpop.f32.mrf.mxu0  ;;  %v301_v58 = vadd.f32 %v300_v42, %v76_v38  ;;  %v316_v2 = vmax.f32 %v297_v48, 0.0  ;;  %v328_v26 = vpack.c.bf16 %v315_v18, %v311_v24 }
  0xf0   :  { %v302_v44 = vpop.f32.mrf.mxu1  ;;  %v250_v51 = vadd.f32 %v249_v43, %v76_v38  ;;  %v317_v11 = vmax.f32 %v248_v57, 0.0  ;;  %v327_v21 = vpack.c.bf16 %v314_v1, %v310_v13 }
  0xf1   :  { %v251_v49 = vpop.f32.mrf.mxu0  ;;  %v303_v52 = vadd.f32 %v302_v44, %v76_v38  ;;  %v319_v12 = vmax.f32 %v301_v58, 0.0  ;;  %v329_v22 = vpack.c.bf16 %v316_v2, %v312_v14 }
  0xf2   :  { %v304_v50 = vpop.f32.mrf.mxu1  ;;  %v252_v53 = vadd.f32 %v251_v49, %v81_v46  ;;  %v318_v5 = vmax.f32 %v250_v51, 0.0 }
  0xf3   :  { %v305_v54 = vadd.f32 %v304_v50, %v81_v46  ;;  %v253_v59 = vpop.f32.mrf.mxu0  ;;  %v320_v6 = vmax.f32 %v303_v52, 0.0 }
  0xf4   :  { %v306_v60 = vpop.f32.mrf.mxu1  ;;  %v254_v63 = vadd.f32 %v253_v59, %v81_v46  ;;  %v321_v3 = vmax.f32 %v252_v53, 0.0 }
  0xf5   :  { %v307_v0 = vadd.f32 %v306_v60, %v81_v46  ;;  %v323_v4 = vmax.f32 %v305_v54, 0.0 }
  0xf6   :  { %v322_v7 = vmax.f32 %v254_v63, 0.0  ;;  %v330_v19 = vpack.c.bf16 %v321_v3, %v317_v11 }
  0xf7   :  { %v324_v8 = vmax.f32 %v307_v0, 0.0  ;;  %v332_v20 = vpack.c.bf16 %v323_v4, %v319_v12 }
  0xf8   :  { %v331_v15 = vpack.c.bf16 %v322_v7, %v318_v5 }
  0xf9   :  { %v333_v16 = vpack.c.bf16 %v324_v8, %v320_v6 }
  0xfa   :  { %352 = vmatprep.subr.bf16.mxu0 %v331_v15 }
  0xfb   :  { %393 = vmatprep.subr.bf16.mxu1 %v333_v16  ;;  %353 = vmatpush1.bf16.msra.mxu0 %v330_v19 }
  0xfc   :  { %394 = vmatpush1.bf16.msra.mxu1 %v332_v20  ;;  %354 = vmatprep.subr.bf16.mxu0 %v327_v21 }
  0xfd   :  { %395 = vmatprep.subr.bf16.mxu1 %v329_v22 }
  0xff   :  { %355 = vmatpush1.bf16.msra.mxu0 %v326_v25 }
 0x100   :  { %396 = vmatpush1.bf16.msra.mxu1 %v328_v26 }
 0x102   :  { %499 = vmatmul.mubr.msk.bf16.vlgmr.msra.gmra.mxu0 %vm336_vm2, %v325_v27 }
 0x103   :  { %500 = vmatmul.mubr.msk.bf16.vlgmr.msra.gmra.mxu1 %vm336_vm2, %v325_v27 }
 0x1c2   :  { %v374_v34 = vpop.f32.mrf.mxu0 }
 0x1c3   :  { %v415_v35 = vpop.f32.mrf.mxu1  ;;  %v375_v39 = vadd.f32 %v374_v34, %v335_v33 }
 0x1c4   :  { %v376_v36 = vpop.f32.mrf.mxu0  ;;  %v416_v40 = vadd.f32 %v415_v35, %v335_v33 }
 0x1c5   :  { %v417_v38 = vpop.f32.mrf.mxu1  ;;  %v377_v41 = vadd.f32 %v376_v36, %v335_v33 }
 0x1c6   :  { %v418_v42 = vadd.f32 %v417_v38, %v335_v33  ;;  %v378_v43 = vpop.f32.mrf.mxu0 }
 0x1c7   :  { %v419_v44 = vpop.f32.mrf.mxu1  ;;  %v426_v45 = vcombine.low %v375_v39, %v377_v41 }
 0x1c8   :  { %v427_v46 = vcombine.low %v416_v40, %v418_v42  ;;  %v379_v47 = vpop.f32.mrf.mxu0 }
 0x1c9   :  { %v420_v48 = vpop.f32.mrf.mxu1  ;;  %v434_v49 = vrot.slane %v426_v45, %v433_v37 }
 0x1ca   :  { %v441_v50 = vrot.slane %v427_v46, %v433_v37 }
 0x1cc   :  { %v442_v51 = vcombine.low %v434_v49, %v441_v50 }
 0x1ce   :  { %v449_v52 = vrot.slane %v442_v51, %v433_v37 }
 0x1d0   :  { %455 = vst.msk [vmem:[#allocation6] sm:$0xf] %vm453_vm3, %v449_v52 }
 0x1d1   :  { %570 = shalt.err (!%p567_p9)
}
 0x1d2   :  { %465 = dma.vmem_to_hbm [thread:$0]  %s463_s13, 64, %s662_s5, [#allocation5]  }
 0x1d3   :  { %581 = dma.done.wait [#allocation5], 64  }
 0x1d4   :  { %582 = vsyncadd [#allocation5], 4294967232 }
 0x1d5   :  { %469 = vsyncpa [#allocation4], 1 }
 0x1d6   :  { %470 = vsyncpa [#allocation5], 1 }

</bundles_post_ra>
